<compile_context>
chip_gen: v5e
topology: v5e:2x2
jax: 0.10.0
libtpu: 0.0.40
codegen_flags: <defaults>
</compile_context>

<pallas_src>
import functools

import jax
import jax.numpy as jnp
from jax.experimental import pallas as pl
from jax.experimental.pallas import tpu as pltpu

HIDDEN = 256        # nn.Linear(input_dim, 256)
HEAD_LANES = 128    # fused head width: [mu | sigma | value | zero-pad]


def _round_up(x, m):
    return ((x + m - 1) // m) * m


def actor_critic_kernel(action_dim, x_ref, wfc_ref, bfc_ref, wh_ref, bh_ref, out_ref):
    """Fused ActorCritic forward for one batch tile.

    x_ref:   (Bt, D_in)        f32 (cast to bf16 in-kernel)
    wfc_ref: (D_in, HIDDEN)    bf16    bfc_ref: (1, HIDDEN)      f32
    wh_ref:  (HIDDEN, 128)     bf16    bh_ref:  (1, 128)         f32
    out_ref: (Bt, 128)         f32     cols: [0:A)=mu, [A:2A)=sigma, [2A]=value
    """
    # In-kernel f32 -> bf16 cast (VPU, hidden under the matmul / DMA).
    x = x_ref[...].astype(jnp.bfloat16)

    # fc -> relu   (bf16 operands on MXU, f32 accumulation; bias+relu in f32)
    h = jnp.dot(x, wfc_ref[...], preferred_element_type=jnp.float32)
    h = jnp.maximum(h + bfc_ref[...], 0.0)
    h = h.astype(jnp.bfloat16)                       # full-rate MXU for the head matmul

    # single fused head matmul: (Bt, H) @ (H, 128) -> lane-dense (Bt, 128)
    z = jnp.dot(h, wh_ref[...], preferred_element_type=jnp.float32) + bh_ref[...]

    # Per-column activation selection, staying lane-dense.
    # (1, 128) iota broadcasts in the compares; no full-tile int32 iota.
    col = jax.lax.broadcasted_iota(jnp.int32, (1, HEAD_LANES), 1)
    is_mu = col < action_dim
    is_sigma = jnp.logical_and(col >= action_dim, col < 2 * action_dim)

    # One EUP exp pass for both heads:
    #   mu    columns: tanh(z) = 1 - 2 / (exp(2z) + 1)   (stable at +/- inf)
    #   sigma columns: exp(z)
    #   value / pad  : identity (exp input masked to 0 -> exp(0)=1, no inf)
    zz = jnp.where(is_mu, 2.0 * z, jnp.where(is_sigma, z, 0.0))
    e = jnp.exp(zz)
    out = jnp.where(is_mu, 1.0 - 2.0 / (e + 1.0), jnp.where(is_sigma, e, z))

    out_ref[...] = out.astype(out_ref.dtype)


def prepare_params(params):
    """One-time packing/casting of the weights for the fused kernel.

    Packs [mu | sigma | value] into a single lane-dense (H, 128) weight and
    (1, 128) bias and casts the MXU operands to bf16.  Call ONCE outside the
    inference/training loop; the steady-state forward then does no re-packing.
    """
    H = params["w_fc"].shape[1]
    A = params["w_mu"].shape[1]
    assert 2 * A + 1 <= HEAD_LANES, "action_dim too large for 128-lane fused head"

    w_heads = jnp.zeros((H, HEAD_LANES), jnp.float32)
    w_heads = w_heads.at[:, 0:A].set(params["w_mu"])
    w_heads = w_heads.at[:, A:2 * A].set(params["w_sigma"])
    w_heads = w_heads.at[:, 2 * A:2 * A + 1].set(params["w_value"])
    b_heads = jnp.zeros((1, HEAD_LANES), jnp.float32)
    b_heads = b_heads.at[:, 0:A].set(params["b_mu"])
    b_heads = b_heads.at[:, A:2 * A].set(params["b_sigma"])
    b_heads = b_heads.at[:, 2 * A:2 * A + 1].set(params["b_value"])

    return dict(
        action_dim=int(A),
        w_fc=params["w_fc"].astype(jnp.bfloat16),
        b_fc=params["b_fc"].astype(jnp.float32),
        w_heads=w_heads.astype(jnp.bfloat16),
        b_heads=b_heads.astype(jnp.float32),
    )


def _choose_batch_tile(B, block_b):
    """Pick the batch tile: as large as block_b allows, but keep >=2 grid steps
    for large batches so both v7x TensorCores get work."""
    b_min = _round_up(B, 16)                  # multiple of 16 (bf16 sublane packing)
    bt = min(block_b, b_min)
    if b_min // bt < 2 and B > 256:           # grid would collapse to 1 step
        bt = _round_up(pl.cdiv(B, 2), 16)
    return bt


def actor_critic_forward(x, packed, *, block_b=1024):
    """x: (B, D_in) f32.  packed: output of prepare_params()."""
    B, D_in = x.shape
    H = packed["w_fc"].shape[1]
    A = packed["action_dim"]

    bt = _choose_batch_tile(B, block_b)
    B_pad = _round_up(B, bt)
    if B_pad != B:
        x = jnp.pad(x, ((0, B_pad - B), (0, 0)))
    grid = (B_pad // bt,)

    # VMEM at bt=1024: x tile 128 KiB f32 + out tile 512 KiB f32, double-buffered
    # (~1.3 MiB) + ~165 KiB of (double-buffered) resident weights -> far below the
    # 32 MiB scoped default and v7x's 64 MiB physical VMEM, so no override needed.
    out = pl.pallas_call(
        functools.partial(actor_critic_kernel, A),
        grid=grid,
        in_specs=[
            pl.BlockSpec((bt, D_in), lambda i: (i, 0)),          # x tile (pipelined)
            pl.BlockSpec((D_in, H), lambda i: (0, 0)),           # resident fc weight
            pl.BlockSpec((1, H), lambda i: (0, 0)),              # resident fc bias
            pl.BlockSpec((H, HEAD_LANES), lambda i: (0, 0)),     # resident fused heads
            pl.BlockSpec((1, HEAD_LANES), lambda i: (0, 0)),     # resident fused bias
        ],
        out_specs=pl.BlockSpec((bt, HEAD_LANES), lambda i: (i, 0)),
        out_shape=jax.ShapeDtypeStruct((B_pad, HEAD_LANES), jnp.float32),
        compiler_params=pltpu.CompilerParams(
            dimension_semantics=("parallel",)),
    )(x, packed["w_fc"], packed["b_fc"], packed["w_heads"], packed["b_heads"])

    mu = out[:B, 0:A]
    sigma = out[:B, A:2 * A]
    value = out[:B, 2 * A:2 * A + 1]
    return mu, sigma, value


def init_params(key, input_dim, action_dim, hidden=HIDDEN):
    """Deterministic init mimicking PyTorch's default uniform(-1/sqrt(fan_in), +)."""
    ks = jax.random.split(key, 8)

    def lin(kw, kb, fan_in, fan_out):
        bound = 1.0 / jnp.sqrt(fan_in)
        w = jax.random.uniform(kw, (fan_in, fan_out), jnp.float32, -bound, bound)
        b = jax.random.uniform(kb, (1, fan_out), jnp.float32, -bound, bound)
        return w, b

    w_fc, b_fc = lin(ks[0], ks[1], input_dim, hidden)
    w_mu, b_mu = lin(ks[2], ks[3], hidden, action_dim)
    w_sg, b_sg = lin(ks[4], ks[5], hidden, action_dim)
    w_v, b_v = lin(ks[6], ks[7], hidden, 1)
    return dict(w_fc=w_fc, b_fc=b_fc,
                w_mu=w_mu, b_mu=b_mu,
                w_sigma=w_sg, b_sigma=b_sg,
                w_value=w_v, b_value=b_v)


def actor_critic_ref(x, p):
    """Pure-f32 reference (exact PyTorch module semantics)."""
    h = jnp.maximum(x @ p["w_fc"] + p["b_fc"], 0.0)
    mu = jnp.tanh(h @ p["w_mu"] + p["b_mu"])
    sigma = jnp.exp(h @ p["w_sigma"] + p["b_sigma"])
    value = h @ p["w_value"] + p["b_value"]
    return mu, sigma, value


def actor_critic_ref_bf16(x, p):
    """Reference matching the kernel's bf16-operand / f32-accumulate numerics."""
    q = lambda a: a.astype(jnp.bfloat16).astype(jnp.float32)
    h = jnp.maximum(q(x) @ q(p["w_fc"]) + p["b_fc"], 0.0)
    h = q(h)
    mu = jnp.tanh(h @ q(p["w_mu"]) + p["b_mu"])
    sigma = jnp.exp(h @ q(p["w_sigma"]) + p["b_sigma"])
    value = h @ q(p["w_value"]) + p["b_value"]
    return mu, sigma, value


if __name__ == "__main__":
    key = jax.random.PRNGKey(0)
    k_x, k_p = jax.random.split(key)

    B, INPUT_DIM, ACTION_DIM = 8, 32, 8
    x = jax.random.normal(k_x, (B, INPUT_DIM), jnp.float32)
    params = init_params(k_p, INPUT_DIM, ACTION_DIM)

    # One-time weight packing / bf16 casting (outside the steady-state loop).
    packed = prepare_params(params)

    mu, sigma, value = actor_critic_forward(x, packed)
    jax.block_until_ready((mu, sigma, value))
    assert mu.shape == (B, ACTION_DIM) and sigma.shape == (B, ACTION_DIM)
    assert value.shape == (B, 1)

    # Tight check vs a reference using the same bf16-operand quantization.
    mu_q, sg_q, v_q = actor_critic_ref_bf16(x, params)
    assert jnp.allclose(mu, mu_q, atol=1e-3), "mu mismatch (bf16 ref)"
    assert jnp.allclose(sigma, sg_q, atol=1e-3), "sigma mismatch (bf16 ref)"
    assert jnp.allclose(value, v_q, atol=1e-3), "value mismatch (bf16 ref)"

    # Loose check vs the full-f32 PyTorch-equivalent reference.
    mu_r, sg_r, v_r = actor_critic_ref(x, params)
    assert jnp.allclose(mu, mu_r, atol=5e-2), "mu mismatch (f32 ref)"
    assert jnp.allclose(sigma, sg_r, atol=5e-2), "sigma mismatch (f32 ref)"
    assert jnp.allclose(value, v_r, atol=5e-2), "value mismatch (f32 ref)"

    print("KERNEL_OK")
</pallas_src>

<mosaic_0001>
module attributes {stable_mosaic.version = 11 : i64} {
  func.func @actor_critic_kernel(%arg0: i32, %arg1: memref<16x32xf32, #tpu.memory_space<vmem>>, %arg2: memref<32x256xbf16, #tpu.memory_space<vmem>>, %arg3: memref<1x256xf32, #tpu.memory_space<vmem>>, %arg4: memref<256x128xbf16, #tpu.memory_space<vmem>>, %arg5: memref<1x128xf32, #tpu.memory_space<vmem>>, %arg6: memref<16x128xf32, #tpu.memory_space<vmem>>) attributes {dimension_semantics = [#tpu.dimension_semantics<parallel>], iteration_bounds = array<i64: 1>, scalar_prefetch = 0 : i64, scratch_operands = 0 : i64, tpu.core_type = #tpu.core_type<tc>, window_params = [{transform_indices = @transform_0, window_bounds = array<i64: 16, 32>}, {pipeline_mode = #tpu.pipeline_mode<synchronous>, transform_indices = @transform_1, window_bounds = array<i64: 32, 256>}, {pipeline_mode = #tpu.pipeline_mode<synchronous>, transform_indices = @transform_2, window_bounds = array<i64: 1, 256>}, {pipeline_mode = #tpu.pipeline_mode<synchronous>, transform_indices = @transform_3, window_bounds = array<i64: 256, 128>}, {pipeline_mode = #tpu.pipeline_mode<synchronous>, transform_indices = @transform_4, window_bounds = array<i64: 1, 128>}, {transform_indices = @transform_5, window_bounds = array<i64: 16, 128>}]} {
    %c0 = arith.constant 0 : index
    %c0_0 = arith.constant 0 : index
    %0 = vector.load %arg1[%c0, %c0_0] : memref<16x32xf32, #tpu.memory_space<vmem>>, vector<16x32xf32>
    %1 = arith.truncf %0 : vector<16x32xf32> to vector<16x32xbf16>
    %c0_1 = arith.constant 0 : index
    %c0_2 = arith.constant 0 : index
    %2 = vector.load %arg2[%c0_1, %c0_2] : memref<32x256xbf16, #tpu.memory_space<vmem>>, vector<32x256xbf16>
    %cst = arith.constant dense<0.000000e+00> : vector<16x256xf32>
    %3 = tpu.matmul %1, %2, %cst {dimension_numbers = #tpu.dot_dimension_numbers<[1], [0], [0], [1], [0, 0, 1, 1], [], []>} : vector<16x32xbf16>, vector<32x256xbf16>, vector<16x256xf32> -> vector<16x256xf32>
    %c0_3 = arith.constant 0 : index
    %c0_4 = arith.constant 0 : index
    %4 = vector.load %arg3[%c0_3, %c0_4] : memref<1x256xf32, #tpu.memory_space<vmem>>, vector<1x256xf32>
    %5 = vector.broadcast %4 : vector<1x256xf32> to vector<16x256xf32>
    %6 = arith.addf %3, %5 : vector<16x256xf32>
    %cst_5 = arith.constant 0.000000e+00 : f32
    %7 = vector.broadcast %cst_5 : f32 to vector<16x256xf32>
    %8 = arith.maximumf %6, %7 : vector<16x256xf32>
    %9 = arith.truncf %8 : vector<16x256xf32> to vector<16x256xbf16>
    %c0_6 = arith.constant 0 : index
    %c0_7 = arith.constant 0 : index
    %10 = vector.load %arg4[%c0_6, %c0_7] : memref<256x128xbf16, #tpu.memory_space<vmem>>, vector<256x128xbf16>
    %cst_8 = arith.constant dense<0.000000e+00> : vector<16x128xf32>
    %11 = tpu.matmul %9, %10, %cst_8 {dimension_numbers = #tpu.dot_dimension_numbers<[1], [0], [0], [1], [0, 0, 1, 1], [], []>} : vector<16x256xbf16>, vector<256x128xbf16>, vector<16x128xf32> -> vector<16x128xf32>
    %c0_9 = arith.constant 0 : index
    %c0_10 = arith.constant 0 : index
    %12 = vector.load %arg5[%c0_9, %c0_10] : memref<1x128xf32, #tpu.memory_space<vmem>>, vector<1x128xf32>
    %13 = vector.broadcast %12 : vector<1x128xf32> to vector<16x128xf32>
    %14 = arith.addf %11, %13 : vector<16x128xf32>
    %15 = tpu.iota {dimensions = array<i32: 1>} : vector<1x128xi32>
    %c8_i32 = arith.constant 8 : i32
    %16 = vector.broadcast %c8_i32 : i32 to vector<1x128xi32>
    %17 = arith.cmpi slt, %15, %16 : vector<1x128xi32>
    %c8_i32_11 = arith.constant 8 : i32
    %18 = vector.broadcast %c8_i32_11 : i32 to vector<1x128xi32>
    %19 = arith.cmpi sge, %15, %18 : vector<1x128xi32>
    %c16_i32 = arith.constant 16 : i32
    %20 = vector.broadcast %c16_i32 : i32 to vector<1x128xi32>
    %21 = arith.cmpi slt, %15, %20 : vector<1x128xi32>
    %22 = arith.andi %19, %21 : vector<1x128xi1>
    %cst_12 = arith.constant 2.000000e+00 : f32
    %23 = vector.broadcast %cst_12 : f32 to vector<16x128xf32>
    %24 = arith.mulf %23, %14 : vector<16x128xf32>
    %cst_13 = arith.constant 0.000000e+00 : f32
    %25 = vector.shape_cast %22 : vector<1x128xi1> to vector<1x128xi1>
    %26 = vector.broadcast %25 : vector<1x128xi1> to vector<16x128xi1>
    %27 = vector.broadcast %cst_13 : f32 to vector<16x128xf32>
    %28 = arith.select %26, %14, %27 : vector<16x128xi1>, vector<16x128xf32>
    %29 = vector.shape_cast %17 : vector<1x128xi1> to vector<1x128xi1>
    %30 = vector.broadcast %29 : vector<1x128xi1> to vector<16x128xi1>
    %31 = arith.select %30, %24, %28 : vector<16x128xi1>, vector<16x128xf32>
    %32 = math.exp %31 : vector<16x128xf32>
    %cst_14 = arith.constant 1.000000e+00 : f32
    %33 = vector.broadcast %cst_14 : f32 to vector<16x128xf32>
    %34 = arith.addf %32, %33 : vector<16x128xf32>
    %cst_15 = arith.constant 2.000000e+00 : f32
    %35 = vector.broadcast %cst_15 : f32 to vector<16x128xf32>
    %36 = arith.divf %35, %34 : vector<16x128xf32>
    %cst_16 = arith.constant 1.000000e+00 : f32
    %37 = vector.broadcast %cst_16 : f32 to vector<16x128xf32>
    %38 = arith.subf %37, %36 : vector<16x128xf32>
    %39 = vector.shape_cast %22 : vector<1x128xi1> to vector<1x128xi1>
    %40 = vector.broadcast %39 : vector<1x128xi1> to vector<16x128xi1>
    %41 = arith.select %40, %32, %14 : vector<16x128xi1>, vector<16x128xf32>
    %42 = vector.shape_cast %17 : vector<1x128xi1> to vector<1x128xi1>
    %43 = vector.broadcast %42 : vector<1x128xi1> to vector<16x128xi1>
    %44 = arith.select %43, %38, %41 : vector<16x128xi1>, vector<16x128xf32>
    %c0_17 = arith.constant 0 : index
    %c0_18 = arith.constant 0 : index
    %45 = vector.load %arg6[%c0_17, %c0_18] : memref<16x128xf32, #tpu.memory_space<vmem>>, vector<16x128xf32>
    tpu.vector_store %arg6[%c0_17, %c0_18], %44 {strides = array<i32>} : memref<16x128xf32, #tpu.memory_space<vmem>>, vector<16x128xf32>,
    return
  }
  func.func @transform_0(%arg0: i32) -> (i32, i32) {
    %c0_i32 = arith.constant 0 : i32
    %c0_i32_0 = arith.constant 0 : i32
    return %arg0, %c0_i32 : i32, i32
  }
  func.func @transform_1(%arg0: i32) -> (i32, i32) {
    %c0_i32 = arith.constant 0 : i32
    %c0_i32_0 = arith.constant 0 : i32
    %c0_i32_1 = arith.constant 0 : i32
    return %c0_i32, %c0_i32_0 : i32, i32
  }
  func.func @transform_2(%arg0: i32) -> (i32, i32) {
    %c0_i32 = arith.constant 0 : i32
    %c0_i32_0 = arith.constant 0 : i32
    %c0_i32_1 = arith.constant 0 : i32
    return %c0_i32, %c0_i32_0 : i32, i32
  }
  func.func @transform_3(%arg0: i32) -> (i32, i32) {
    %c0_i32 = arith.constant 0 : i32
    %c0_i32_0 = arith.constant 0 : i32
    %c0_i32_1 = arith.constant 0 : i32
    return %c0_i32, %c0_i32_0 : i32, i32
  }
  func.func @transform_4(%arg0: i32) -> (i32, i32) {
    %c0_i32 = arith.constant 0 : i32
    %c0_i32_0 = arith.constant 0 : i32
    %c0_i32_1 = arith.constant 0 : i32
    return %c0_i32, %c0_i32_0 : i32, i32
  }
  func.func @transform_5(%arg0: i32) -> (i32, i32) {
    %c0_i32 = arith.constant 0 : i32
    %c0_i32_0 = arith.constant 0 : i32
    return %arg0, %c0_i32 : i32, i32
  }
}

</mosaic_0001>

<bundles_post_ra>
// kernel: tpu_custom_call.1
= control target key start
LH: loop header
LB: loop body
LE: loop exit
PB: predicated region body
PF: predicated region fallthrough
CT: control target
= control target key end

     0   :  { %10 = vsyncpa [#allocation3], 0  ;;  %s734_s0 = inlined_call_operand.hbm [shape: f32[16,32], index: 0, kind: input, shape index: {}]   ;;  %s735_s1 = inlined_call_operand.hbm [shape: bf16[32,256], index: 1, kind: input, shape index: {}]   ;;  %s736_s2 = inlined_call_operand.hbm [shape: f32[1,256], index: 2, kind: input, shape index: {}]   ;;  %s737_s3 = inlined_call_operand.hbm [shape: bf16[256,128], index: 3, kind: input, shape index: {}]   ;;  %s738_s4 = inlined_call_operand.vmem [shape: f32[1,128], index: 4, kind: input, shape index: {}]   ;;  %s739_s5 = inlined_call_operand.hbm [shape: f32[16,128], index: 5, kind: output, shape index: {}]  }
   0x1   :  { %11 = vsyncpa [#allocation6], 0 }
   0x2   :  { %12 = vsyncpa [#allocation9], 0 }
   0x3   :  { %13 = vsyncpa [#allocation4], 0  ;;  %s31_s20 = sshll.u32 %s735_s1, 4  ;;  %s643_s21 = smov [#allocation5]   ;;  %s32_s20 = int_to_ptr.hbm [resolvable:$true] %s31_s20 }
   0x4   :  { %s33_s22 = sshll.u32 %s643_s21, 4  ;;  %s18_s25 = sshll.u32 %s734_s0, 4  ;;  %s34_s22 = int_to_ptr.vmem [resolvable:$true] %s33_s22  ;;  %s19_s25 = int_to_ptr.hbm [resolvable:$true] %s18_s25 }
   0x5   :  { %s644_s26 = smov 128   ;;  %s645_s27 = smov 8  }
   0x6   :  { %39 = dma.hbm_to_vmem [thread:$0]  %s32_s20, 512, %s34_s22, [#allocation6], %s644_s26, %s644_s26, %s645_s27  }
   0x7   :  { %s646_s28 = smov [#allocation2]   ;;  %s45_s1 = sshll.u32 %s736_s2, 4  ;;  %s46_s1 = int_to_ptr.hbm [resolvable:$true] %s45_s1 }
   0x8   :  { %s20_s29 = sshll.u32 %s646_s28, 4  ;;  %s55_s8 = sshll.u32 %s737_s3, 4  ;;  %s21_s29 = int_to_ptr.vmem [resolvable:$true] %s20_s29  ;;  %s56_s8 = int_to_ptr.hbm [resolvable:$true] %s55_s8 }
   0x9   :  { %26 = dma.hbm_to_vmem [thread:$0]  %s19_s25, 256, %s21_s29, [#allocation3], %s644_s26, %s644_s26, %s645_s27  }
   0xa   :  { %s647_s9 = smov [#allocation7]   ;;  %s648_s11 = smov [#allocation8]  }
   0xb   :  { %s47_s10 = sshll.u32 %s647_s9, 4  ;;  %s57_s12 = sshll.u32 %s648_s11, 4  ;;  %s48_s10 = int_to_ptr.vmem [resolvable:$true] %s47_s10  ;;  %s58_s12 = int_to_ptr.vmem [resolvable:$true] %s57_s12 }
   0xc   :  { %50 = dma.hbm_to_vmem [thread:$0]  %s46_s1, 32, %s48_s10, [#allocation6]  }
   0xd   :  { %s649_s13 = smov 64   ;;  %s650_s2 = smov 4  }
   0xe   :  { %63 = dma.hbm_to_vmem [thread:$0]  %s56_s8, 2048, %s58_s12, [#allocation9], %s649_s13, %s649_s13, %s650_s2  }
   0xf   :  { %635 = dma.done.wait [#allocation3], 256  }
  0x10   :  { %636 = vsyncadd [#allocation3], 4294967040 }
  0x11   :  { %637 = dma.done.wait [#allocation6], 544  }
  0x12   :  { %638 = vsyncadd [#allocation6], 4294966752 }
  0x13   :  { %639 = dma.done.wait [#allocation9], 2048  }
  0x14   :  { %640 = vsyncadd [#allocation9], 4294965248  ;;  %v405_v0 = vld [vmem:[#allocation5 + $0x10] sm:$0xf]  ;;  %v480_v1 = vld [vmem:[#allocation5 + $0x14] sm:$0xf0]  ;;  %v314_v48 = vlaneseq }
  0x15   :  { %v479_v2 = vld [vmem:[#allocation5 + $0x14] sm:$0xf]  ;;  %v406_v3 = vor.u32 %v480_v1, %v405_v0  ;;  %v407_v4 = vld [vmem:[#allocation5 + $0x18] sm:$0xf0]  ;;  %v397_v5 = vld [vmem:[#allocation5] sm:$0xf] }
  0x16   :  { %v478_v6 = vld [vmem:[#allocation5 + $0x4] sm:$0xf0]  ;;  %v410_v7 = vor.u32 %v479_v2, %v407_v4  ;;  %v477_v8 = vld [vmem:[#allocation5 + $0x4] sm:$0xf]  ;;  %v399_v9 = vld [vmem:[#allocation5 + $0x8] sm:$0xf0] }
  0x17   :  { %v83_v10 = vld [vmem:[#allocation2] sm:$0xff]  ;;  %126 = vmatpush.bf16.msra.mxu0 %v406_v3  ;;  %v398_v11 = vor.u32 %v478_v6, %v397_v5  ;;  %v84_v12 = vld [vmem:[#allocation2 + $0x8] sm:$0xff]  ;;  %v402_v15 = vor.u32 %v477_v8, %v399_v9  ;;  %vm116_vm0 = vcmask 261120   ;;  %v485_v21 = vld [vmem:[#allocation8 + $0x20] sm:$0xff]  ;;  %v700_v49 = vand.u32 127, %v314_v48  ;;  %s380_s18 = sshll.u32 %s739_s5, 4  ;;  %s381_s18 = int_to_ptr.hbm [resolvable:$true] %s380_s18 }
  0x18   :  { %v488_v13 = vld [vmem:[#allocation8 + $0x38] sm:$0xff]  ;;  %140 = vmatpush.bf16.msra.mxu1 %v410_v7  ;;  %v487_v16 = vld [vmem:[#allocation8 + $0x30] sm:$0xff]  ;;  %v85_v18 = vpack.c.bf16 %v84_v12, %v83_v10  ;;  %v486_v19 = vld [vmem:[#allocation8 + $0x28] sm:$0xff] }
  0x19   :  { %v496_v14 = vld [vmem:[#allocation8 + $0x78] sm:$0xff]  ;;  %286 = vmatpush.bf16.msra.mxu2 %v488_v13  ;;  %v495_v17 = vld [vmem:[#allocation8 + $0x70] sm:$0xff]  ;;  %v494_v20 = vld [vmem:[#allocation8 + $0x68] sm:$0xff]  ;;  %vm317_vm1 = vcmp.ge.s32.totalorder %v700_v49, 8  ;;  %vm318_vm2 = vcmp.lt.s32.totalorder %v700_v49, 16  ;;  %vm316_vm4 = vcmp.lt.s32.totalorder %v700_v49, 8 }
  0x1a   :  { %300 = vmatpush.bf16.msra.mxu3 %v496_v14  ;;  %v493_v22 = vld [vmem:[#allocation8 + $0x60] sm:$0xff]  ;;  %v484_v23 = vld [vmem:[#allocation8 + $0x18] sm:$0xff]  ;;  %v483_v25 = vld [vmem:[#allocation8 + $0x10] sm:$0xff] }
  0x1b   :  { %127 = vmatpush.bf16.msra.mxu0 %v398_v11  ;;  %v492_v24 = vld [vmem:[#allocation8 + $0x58] sm:$0xff]  ;;  %v491_v26 = vld [vmem:[#allocation8 + $0x50] sm:$0xff]  ;;  %v482_v27 = vld [vmem:[#allocation8 + $0x8] sm:$0xff] }
  0x1c   :  { %141 = vmatpush.bf16.msra.mxu1 %v402_v15  ;;  %v490_v28 = vld [vmem:[#allocation8 + $0x48] sm:$0xff]  ;;  %v481_v29 = vld [vmem:[#allocation8] sm:$0xff]  ;;  %v90_v31 = vld [vmem:[#allocation7] sm:$0x3] }
  0x1d   :  { %287 = vmatpush.bf16.msra.mxu2 %v487_v16  ;;  %v489_v30 = vld [vmem:[#allocation8 + $0x40] sm:$0xff]  ;;  %v92_v34 = vperm.slane %v90_v31, 0  ;;  %v93_v35 = vperm.slane %v90_v31, 1  ;;  %v506_v50 = vld [vmem:[%s738_s4] ss:$0 sm:$0xff]  ;;  %vm707_vm3 = vmand %vm317_vm1, %vm318_vm2  ;;  %s651_s4 = smov [#allocation10]  }
  0x1e   :  { %301 = vmatpush.bf16.msra.mxu3 %v495_v17  ;;  %411 = vmatmul.msk.bf16.vlgmr.msra.gmra.mxu0 %vm116_vm0, %v85_v18  ;;  %s378_s15 = sshll.u32 %s651_s4, 4  ;;  %s379_s15 = int_to_ptr.vmem [resolvable:$true] %s378_s15 }
  0x1f   :  { %412 = vmatmul.msk.bf16.vlgmr.msra.gmra.mxu1 %vm116_vm0, %v85_v18 }
  0x21   :  { %288 = vmatpush.bf16.msra.mxu2 %v486_v19 }
  0x22   :  { %302 = vmatpush.bf16.msra.mxu3 %v494_v20 }
  0x25   :  { %289 = vmatpush.bf16.msra.mxu2 %v485_v21 }
  0x26   :  { %303 = vmatpush.bf16.msra.mxu3 %v493_v22 }
  0x29   :  { %290 = vmatpush.bf16.msra.mxu2 %v484_v23 }
  0x2a   :  { %304 = vmatpush.bf16.msra.mxu3 %v492_v24 }
  0x2d   :  { %291 = vmatpush.bf16.msra.mxu2 %v483_v25 }
  0x2e   :  { %305 = vmatpush.bf16.msra.mxu3 %v491_v26 }
  0x31   :  { %292 = vmatpush.bf16.msra.mxu2 %v482_v27 }
  0x32   :  { %306 = vmatpush.bf16.msra.mxu3 %v490_v28 }
  0x35   :  { %293 = vmatpush.bf16.msra.mxu2 %v481_v29 }
  0x36   :  { %307 = vmatpush.bf16.msra.mxu3 %v489_v30 }
  0x9b   :  { %v129_v32 = vpop.f32.mrf.mxu0 }
  0x9c   :  { %v143_v33 = vpop.f32.mrf.mxu1  ;;  %v130_v36 = vadd.f32 %v129_v32, %v92_v34 }
  0x9d   :  { %v144_v37 = vadd.f32 %v143_v33, %v93_v35 }
  0x9e   :  { %v148_v42 = vmax.f32 %v130_v36, 0.0 }
  0x9f   :  { %v149_v44 = vmax.f32 %v144_v37, 0.0 }
  0xa3   :  { %v131_v38 = vpop.f32.mrf.mxu0 }
  0xa4   :  { %v132_v39 = vadd.f32 %v131_v38, %v92_v34  ;;  %v145_v40 = vpop.f32.mrf.mxu1 }
  0xa5   :  { %v146_v41 = vadd.f32 %v145_v40, %v93_v35 }
  0xa6   :  { %v150_v43 = vmax.f32 %v132_v39, 0.0 }
  0xa7   :  { %v151_v45 = vmax.f32 %v146_v41, 0.0 }
  0xa8   :  { %v152_v46 = vpack.c.bf16 %v150_v43, %v148_v42 }
  0xa9   :  { %v153_v47 = vpack.c.bf16 %v151_v45, %v149_v44 }
  0xaa   :  { %294 = vmatmul.bf16.vlgmr.msra.gmra.mxu2 %v152_v46 }
  0xab   :  { %308 = vmatmul.bf16.vlgmr.msra.gmra.mxu3 %v153_v47 }
 0x12d   :  { %v295_v51 = vpop.f32.mrf.mxu2 }
 0x12e   :  { %v296_v52 = vadd.f32 %v506_v50, %v295_v51  ;;  %v309_v53 = vpop.f32.mrf.mxu3 }
 0x130   :  { %v310_v55 = vadd.f32 %v309_v53, %v296_v52 }
 0x132   :  { %v320_v56 = vmul.f32 2.0, %v310_v55  ;;  %v324_v57 = vsel %vm707_vm3, %v310_v55, 0.0 }
 0x134   :  { %v328_v58 = vsel %vm316_vm4, %v320_v56, %v324_v57 }
 0x135   :  { %v330_v59 = vmul.f32 1.442695, %v328_v58  ;;  %v297_v60 = vpop.f32.mrf.mxu2 }
 0x136   :  { %v298_v61 = vadd.f32 %v506_v50, %v297_v60  ;;  %v311_v62 = vpop.f32.mrf.mxu3 }
 0x137   :  { %507 = vpow2.f32 %v330_v59 }
 0x138   :  { %v312_v63 = vadd.f32 %v311_v62, %v298_v61 }
 0x13a   :  { %v321_v0 = vmul.f32 2.0, %v312_v63  ;;  %v325_v1 = vsel %vm707_vm3, %v312_v63, 0.0 }
 0x13c   :  { %v329_v2 = vsel %vm316_vm4, %v321_v0, %v325_v1 }
 0x13d   :  { %v508_v3 = vpop.eup %507  ;;  %v332_v4 = vmul.f32 1.442695, %v329_v2 }
 0x13e   :  { %v334_v5 = vadd.f32 1.0, %v508_v3  ;;  %v368_v26 = vsel %vm707_vm3, %v508_v3, %v310_v55 }
 0x13f   :  { %509 = vpow2.f32 %v332_v4 }
 0x140   :  { %511 = vrcp.f32 %v334_v5  ;;  %v347_v11 = vand.u32 2147483648, %v334_v5  ;;  %v345_v13 = vand.u32 2147483647, %v334_v5  ;;  %vm341_vm6 = vweird.f32 %v334_v5 }
 0x142   :  { %v348_v16 = vor.u32 1.1754944e-38, %v347_v11  ;;  %vm346_vm8 = vcmp.eq.f32.partialorder %v345_v13, 8.507059e+37 }
 0x145   :  { %v510_v6 = vpop.eup %509 }
 0x146   :  { %v512_v7 = vpop.eup %511  ;;  %v335_v8 = vadd.f32 1.0, %v510_v6  ;;  %v369_v34 = vsel %vm707_vm3, %v510_v6, %v312_v63 }
 0x147   :  { %v337_v9 = vmul.f32 %v512_v7, %v334_v5  ;;  %vm342_vm5 = vweird.f32 %v512_v7 }
 0x148   :  { %513 = vrcp.f32 %v335_v8  ;;  %vm343_vm7 = vmor %vm341_vm6, %vm342_vm5  ;;  %v362_v22 = vand.u32 2147483648, %v335_v8  ;;  %v360_v24 = vand.u32 2147483647, %v335_v8  ;;  %vm356_vm10 = vweird.f32 %v335_v8 }
 0x149   :  { %v338_v10 = vsub.f32 1.0, %v337_v9 }
 0x14a   :  { %v363_v29 = vor.u32 1.1754944e-38, %v362_v22  ;;  %vm361_vm12 = vcmp.eq.f32.partialorder %v360_v24, 8.507059e+37 }
 0x14b   :  { %v339_v12 = vmul.f32 %v512_v7, %v338_v10 }
 0x14d   :  { %v340_v14 = vadd.f32 %v512_v7, %v339_v12 }
 0x14e   :  { %v514_v15 = vpop.eup %513 }
 0x14f   :  { %v344_v17 = vsel %vm343_vm7, %v512_v7, %v340_v14  ;;  %v352_v18 = vmul.f32 %v514_v15, %v335_v8  ;;  %vm357_vm9 = vweird.f32 %v514_v15 }
 0x150   :  { %v349_v19 = vsel %vm346_vm8, %v348_v16, %v344_v17  ;;  %vm358_vm11 = vmor %vm356_vm10, %vm357_vm9 }
 0x151   :  { %v350_v20 = vmul.f32 2.0, %v349_v19  ;;  %v353_v21 = vsub.f32 1.0, %v352_v18 }
 0x153   :  { %v354_v23 = vmul.f32 %v514_v15, %v353_v21  ;;  %v366_v25 = vsub.f32 1.0, %v350_v20 }
 0x155   :  { %v355_v27 = vadd.f32 %v514_v15, %v354_v23  ;;  %v370_v28 = vsel %vm316_vm4, %v366_v25, %v368_v26 }
 0x156   :  { %372 = vst [vmem:[#allocation10] sm:$0xff] %v370_v28 }
 0x157   :  { %v359_v30 = vsel %vm358_vm11, %v514_v15, %v355_v27 }
 0x158   :  { %v364_v31 = vsel %vm361_vm12, %v363_v29, %v359_v30 }
 0x159   :  { %v365_v32 = vmul.f32 2.0, %v364_v31 }
 0x15b   :  { %v367_v33 = vsub.f32 1.0, %v365_v32 }
 0x15d   :  { %v371_v35 = vsel %vm316_vm4, %v367_v33, %v369_v34 }
 0x15e   :  { %373 = vst [vmem:[#allocation10 + $0x8] sm:$0xff] %v371_v35 }
 0x15f   :  { %386 = dma.vmem_to_hbm [thread:$0]  %s379_s15, 256, %s381_s18, [#allocation4], %s644_s26, %s644_s26, %s645_s27  }
 0x160   :  { %641 = dma.done.wait [#allocation4], 256  }
 0x161   :  { %642 = vsyncadd [#allocation4], 4294967040 }
 0x162   :  { %391 = vsyncpa [#allocation3], 1 }
 0x163   :  { %392 = vsyncpa [#allocation6], 1 }
 0x164   :  { %393 = vsyncpa [#allocation9], 1 }
 0x165   :  { %394 = vsyncpa [#allocation4], 1 }

</bundles_post_ra>
